<compile_context>
chip_gen: v7x
topology: tpu7x:2x2x1
jax: 0.10.0
libtpu: 0.0.40
codegen_flags: <defaults>
</compile_context>

<pallas_src>
import functools

import jax
import jax.numpy as jnp
from jax import lax
from jax.experimental import pallas as pl
from jax.experimental.pallas import tpu as pltpu


# ---------------------------------------------------------------------------
# Blocking helpers
# ---------------------------------------------------------------------------
def _round_up(x, m):
    return (x + m - 1) // m * m


def _choose_blocking(batch, seq_len, feat, itemsize, *, target_rows=2048, min_steps=2,
                     max_block_bytes=8 * 1024 * 1024):
    """Rows per grid step (multiple of 8) and padded batch so grid >= min_steps steps."""
    bblk = max(8, (target_rows // max(seq_len, 1)) // 8 * 8)
    rows_cap = max(8, (max_block_bytes // max(seq_len * feat * itemsize, 1)) // 8 * 8)
    bblk = min(bblk, rows_cap)
    # Never take a block bigger than min_steps grid steps need (v7x dual-TC sharding).
    bblk = min(bblk, max(8, _round_up(pl.cdiv(batch, min_steps), 8)))
    b_pad = _round_up(batch, bblk)
    if b_pad // bblk < min_steps:
        b_pad = bblk * min_steps
    return bblk, b_pad


# ---------------------------------------------------------------------------
# Word/sentence AttentionLayer kernel
# ---------------------------------------------------------------------------
def _attention_kernel(seq_ref, len_ref, w_in_ref, b_in_ref, w_out_ref,
                      out_ref, att_ref, *, ctx_on_mxu):
    bblk, L, D = seq_ref.shape
    A = w_in_ref.shape[0]

    s = seq_ref[...]                                    # (bblk, L, D) f32 or bf16
    s2 = s.reshape(bblk * L, D)                         # free: L is a sublane-tile multiple

    # tanh(x @ W_in^T + b_in): NT contraction, f32 accumulation on the MXU.
    h = lax.dot_general(s2, w_in_ref[...], (((1,), (1,)), ((), ())),
                        preferred_element_type=jnp.float32)
    h = jnp.tanh(h + b_in_ref[...])                     # (bblk*L, A) f32

    # Attention logits: VPU multiply + lane reduce (avoids an M=1 MXU matmul and the
    # (1, bblk*L) -> (bblk, L) relayout).
    h3 = h.reshape(bblk, L, A)                          # free: L multiple of 8 (f32 acc)
    logits = jnp.sum(h3 * w_out_ref[...], axis=-1)      # (bblk, L)

    lengths = len_ref[...]                              # (bblk, 1) int32
    pos = lax.broadcasted_iota(jnp.int32, (bblk, L), 1)
    masked = jnp.where(pos < lengths, logits, jnp.float32(-1e30))  # finite: no -inf NaNs

    # Numerically-stable masked softmax over the sequence (lane) axis.
    m = jnp.max(masked, axis=-1, keepdims=True)
    e = jnp.exp(masked - m)
    denom = jnp.sum(e, axis=-1, keepdims=True)
    p = e * pl.reciprocal(denom, approx=True)           # EUP slot, frees the VPU
    # Zero-length rows -> zero weights / zero context (mirrors filter_sents +
    # make_tokens_att_full; PyTorch would produce 0/0 NaN here).
    p = jnp.where(lengths > 0, p, 0.0)
    att_ref[...] = p.astype(att_ref.dtype)

    if ctx_on_mxu:
        # Long sequences: batched (1, L) @ (L, D) per row on the MXU.
        ctx = lax.dot_general(p.astype(s.dtype).reshape(bblk, 1, L), s,
                              (((2,), (1,)), ((0,), (0,))),
                              preferred_element_type=jnp.float32).reshape(bblk, D)
    else:
        # Small/moderate L: VPU multiply + sublane reduce (MXU would be 1/256 utilized).
        ctx = jnp.sum(p[:, :, None] * s, axis=1)        # (bblk, D) f32
    out_ref[...] = ctx.astype(out_ref.dtype)


def attention_layer(seq_input, lengths, w_in, b_in, w_out, *,
                    compute_dtype=jnp.float32, target_rows=2048, min_steps=2,
                    mxu_ctx_threshold=256):
    """Pallas AttentionLayer.forward.

    seq_input: (B, L, D); lengths: (B,) int; w_in: (A, D); b_in: (A,); w_out: (1, A).
    compute_dtype: dtype of the HBM-resident seq / w_in operands (f32 or bf16);
    accumulation, tanh and softmax stay f32.
    Returns (context (B, D) f32, attention_weights (B, L) f32)."""
    B, L, D = seq_input.shape
    A = w_in.shape[0]
    cdt = jnp.dtype(compute_dtype)

    # Pad L to the sublane tile so the (bblk, L, D) -> (bblk*L, D) reshape is free.
    l_mult = 16 if cdt == jnp.bfloat16 else 8
    Lp = _round_up(L, l_mult)
    bblk, b_pad = _choose_blocking(B, Lp, D, cdt.itemsize,
                                   target_rows=target_rows, min_steps=min_steps)

    seq = seq_input.astype(cdt)            # bf16 cast done once on host, not per step
    if b_pad != B or Lp != L:
        seq = jnp.pad(seq, ((0, b_pad - B), (0, Lp - L), (0, 0)))
    lens = lengths.reshape(-1).astype(jnp.int32)
    if b_pad != B:
        lens = jnp.pad(lens, (0, b_pad - B))
    lens = lens.reshape(b_pad, 1)

    w_in_c = w_in.astype(cdt)
    b_in2d = b_in.reshape(1, A).astype(jnp.float32)
    w_out2d = w_out.reshape(1, A).astype(jnp.float32)

    # Right-sized VMEM request: double-buffered seq block + outputs + weights + headroom.
    blk_bytes = bblk * Lp * D * cdt.itemsize
    vmem_bytes = 2 * (blk_bytes + bblk * (D + Lp) * 4) + A * D * cdt.itemsize + 8 * A
    vmem_bytes = min(max(int(vmem_bytes) + (8 << 20), 16 << 20), 32 << 20)

    kernel = functools.partial(_attention_kernel, ctx_on_mxu=Lp > mxu_ctx_threshold)

    out, att = pl.pallas_call(
        kernel,
        out_shape=(
            jax.ShapeDtypeStruct((b_pad, D), jnp.float32),
            jax.ShapeDtypeStruct((b_pad, Lp), jnp.float32),
        ),
        grid=(b_pad // bblk,),
        in_specs=[
            pl.BlockSpec((bblk, Lp, D), lambda i: (i, 0, 0)),   # sequence features
            pl.BlockSpec((bblk, 1), lambda i: (i, 0)),          # lengths
            pl.BlockSpec((A, D), lambda i: (0, 0)),             # W_in (resident)
            pl.BlockSpec((1, A), lambda i: (0, 0)),             # b_in
            pl.BlockSpec((1, A), lambda i: (0, 0)),             # W_out
        ],
        out_specs=(
            pl.BlockSpec((bblk, D), lambda i: (i, 0)),          # context (lane-dense)
            pl.BlockSpec((bblk, Lp), lambda i: (i, 0)),         # attention weights
        ),
        compiler_params=pltpu.CompilerParams(
            dimension_semantics=("parallel",),                  # shards across v7x TCs
            vmem_limit_bytes=vmem_bytes,
        ),
    )(seq, lens, w_in_c, b_in2d, w_out2d)

    if b_pad != B or Lp != L:
        out = out[:B]
        att = att[:B, :L]
    return out, att


# ---------------------------------------------------------------------------
# Fused document head: make_tokens_att_full masking + sentence attention + final linear
# ---------------------------------------------------------------------------
def _document_head_kernel(sent_ref, dlen_ref, w_in_ref, b_in_ref, w_out_ref,
                          w_fin_ref, b_fin_ref, logits_ref, doc_ref, att_ref):
    Bd, S, D = sent_ref.shape
    A = w_in_ref.shape[0]

    lengths = dlen_ref[...]                               # (Bd, 1) int32
    pos = lax.broadcasted_iota(jnp.int32, (Bd, S), 1)
    valid = pos < lengths
    # make_tokens_att_full: zero sentence vectors beyond each document's length.
    sv = jnp.where(valid[..., None], sent_ref[...], 0.0)  # (Bd, S, D)

    h = lax.dot_general(sv.reshape(Bd * S, D), w_in_ref[...], (((1,), (1,)), ((), ())),
                        preferred_element_type=jnp.float32)
    h = jnp.tanh(h + b_in_ref[...])                        # (Bd*S, A)
    logits = jnp.sum(h.reshape(Bd, S, A) * w_out_ref[...], axis=-1)   # (Bd, S)

    masked = jnp.where(valid, logits, jnp.float32(-1e30))
    m = jnp.max(masked, axis=-1, keepdims=True)
    e = jnp.exp(masked - m)
    p = e * pl.reciprocal(jnp.sum(e, axis=-1, keepdims=True), approx=True)
    p = jnp.where(lengths > 0, p, 0.0)
    att_ref[...] = p

    ctx = jnp.sum(p[:, :, None] * sv, axis=1)              # (Bd, D)
    doc_ref[...] = ctx

    y = lax.dot_general(ctx, w_fin_ref[...], (((1,), (1,)), ((), ())),
                        preferred_element_type=jnp.float32) + b_fin_ref[...]
    logits_ref[...] = y


def document_head(sent_feats, doc_lengths, w_in, b_in, w_out, w_fin, b_fin):
    """One pallas_call for the tiny second stage (launch-latency dominated otherwise).

    sent_feats: (B_docs, max_sent, D); doc_lengths: (B_docs,).
    Returns (logits (B_docs, O), doc_vec (B_docs, D), sent_att (B_docs, max_sent))."""
    Bd, S, D = sent_feats.shape
    A = w_in.shape[0]
    O = w_fin.shape[0]
    return pl.pallas_call(
        _document_head_kernel,
        out_shape=(
            jax.ShapeDtypeStruct((Bd, O), jnp.float32),
            jax.ShapeDtypeStruct((Bd, D), jnp.float32),
            jax.ShapeDtypeStruct((Bd, S), jnp.float32),
        ),
    )(sent_feats.astype(jnp.float32),
      doc_lengths.reshape(Bd, 1).astype(jnp.int32),
      w_in.astype(jnp.float32), b_in.reshape(1, A).astype(jnp.float32),
      w_out.reshape(1, A).astype(jnp.float32),
      w_fin.astype(jnp.float32), b_fin.reshape(1, O).astype(jnp.float32))


# ---------------------------------------------------------------------------
# Pure-JAX reference (mirrors the PyTorch AttentionLayer exactly)
# ---------------------------------------------------------------------------
def _attention_ref(seq_input, lengths, w_in, b_in, w_out):
    B, L, D = seq_input.shape
    d = jnp.tanh(seq_input @ w_in.T + b_in)               # (B, L, A)
    logits = d @ w_out.T                                  # (B, L, 1)
    exps = jnp.exp(logits)
    mask = (jnp.arange(L)[None, :] < lengths[:, None]).astype(jnp.float32)[:, :, None]
    masked = exps * mask
    weights = masked / jnp.sum(masked, axis=1, keepdims=True)
    out = jnp.sum(weights * seq_input, axis=1)
    return out, weights[..., 0]


if __name__ == "__main__":
    key = jax.random.PRNGKey(0)
    ks = jax.random.split(key, 8)

    B_DOCS, MAX_SENT, MAX_WORD = 2, 4, 8
    HID = 64
    D = 2 * HID                  # bi-LSTM feature width (lane-dense 128)
    A = 64                       # attention_size
    OUT = 8                      # output_size
    n_sents = B_DOCS * MAX_SENT

    # TODO(synk): the nn.Embedding lookup and the two packed bidirectional LSTM layers
    # (sort + pack_padded_sequence recurrence) have no clean Pallas equivalent; the random
    # features below stand in for their outputs.
    token_feats = jax.random.normal(ks[0], (n_sents, MAX_WORD, D), dtype=jnp.float32)
    seq_lengths = jnp.array([8, 5, 8, 3, 7, 8, 2, 6], dtype=jnp.int32)   # per sentence
    doc_lengths = jnp.array([4, 3], dtype=jnp.int32)                     # per document

    w_in0 = jax.random.normal(ks[1], (A, D), jnp.float32) * 0.1
    b_in0 = jax.random.normal(ks[2], (A,), jnp.float32) * 0.1
    w_out0 = jax.random.normal(ks[3], (1, A), jnp.float32) * 0.1
    w_in1 = jax.random.normal(ks[4], (A, D), jnp.float32) * 0.1
    b_in1 = jax.random.normal(ks[5], (A,), jnp.float32) * 0.1
    w_out1 = jax.random.normal(ks[6], (1, A), jnp.float32) * 0.1
    w_fin = jax.random.normal(ks[7], (OUT, D), jnp.float32) * 0.1
    b_fin = jnp.zeros((OUT,), jnp.float32)

    # --- Pallas hierarchical forward: word-level att kernel -> fused doc-level kernel ---
    sent_vecs, word_att = attention_layer(token_feats, seq_lengths, w_in0, b_in0, w_out0)
    sent_feats = sent_vecs.reshape(B_DOCS, MAX_SENT, D)
    logits, doc_vec, sent_att = document_head(sent_feats, doc_lengths,
                                              w_in1, b_in1, w_out1, w_fin, b_fin)
    jax.block_until_ready((logits, sent_vecs, word_att, doc_vec, sent_att))

    # --- pure-JAX reference of the same pipeline (mirrors the PyTorch module) ---
    r_sent, r_watt = _attention_ref(token_feats, seq_lengths, w_in0, b_in0, w_out0)
    sent_mask = (jnp.arange(MAX_SENT)[None, :] < doc_lengths[:, None]).astype(jnp.float32)
    r_sf = r_sent.reshape(B_DOCS, MAX_SENT, D) * sent_mask[:, :, None]
    r_doc, r_satt = _attention_ref(r_sf, doc_lengths, w_in1, b_in1, w_out1)
    r_logits = r_doc @ w_fin.T + b_fin

    tol = dict(atol=5e-3, rtol=5e-3)
    assert jnp.allclose(word_att, r_watt, **tol)
    assert jnp.allclose(sent_vecs, r_sent, **tol)
    assert jnp.allclose(sent_att, r_satt, **tol)
    assert jnp.allclose(doc_vec, r_doc, **tol)
    assert jnp.allclose(logits, r_logits, **tol)

    # --- bf16 HBM-resident operands (MXU-native on v5e/v6e/v7x); f32 accumulation ---
    sent_bf, watt_bf = attention_layer(token_feats, seq_lengths, w_in0, b_in0, w_out0,
                                       compute_dtype=jnp.bfloat16)
    jax.block_until_ready((sent_bf, watt_bf))
    assert jnp.allclose(watt_bf, r_watt, atol=0.1, rtol=0.1)
    assert jnp.allclose(sent_bf, r_sent, atol=0.1, rtol=0.1)

    print("KERNEL_OK")
</pallas_src>

<mosaic_0001>
module attributes {stable_mosaic.version = 11 : i64} {
  func.func @_attention_kernel(%arg0: i32, %arg1: memref<8x8x128xf32, #tpu.memory_space<vmem>>, %arg2: memref<8x1xi32, #tpu.memory_space<vmem>>, %arg3: memref<64x128xf32, #tpu.memory_space<vmem>>, %arg4: memref<1x64xf32, #tpu.memory_space<vmem>>, %arg5: memref<1x64xf32, #tpu.memory_space<vmem>>, %arg6: memref<8x128xf32, #tpu.memory_space<vmem>>, %arg7: memref<8x8xf32, #tpu.memory_space<vmem>>) attributes {dimension_semantics = [#tpu.dimension_semantics<parallel>], iteration_bounds = array<i64: 2>, scalar_prefetch = 0 : i64, scratch_operands = 0 : i64, tpu.core_type = #tpu.core_type<tc>, window_params = [{transform_indices = @transform_0, window_bounds = array<i64: 8, 8, 128>}, {transform_indices = @transform_1, window_bounds = array<i64: 8, 1>}, {pipeline_mode = #tpu.pipeline_mode<synchronous>, transform_indices = @transform_2, window_bounds = array<i64: 64, 128>}, {pipeline_mode = #tpu.pipeline_mode<synchronous>, transform_indices = @transform_3, window_bounds = array<i64: 1, 64>}, {pipeline_mode = #tpu.pipeline_mode<synchronous>, transform_indices = @transform_4, window_bounds = array<i64: 1, 64>}, {transform_indices = @transform_5, window_bounds = array<i64: 8, 128>}, {transform_indices = @transform_6, window_bounds = array<i64: 8, 8>}]} {
    %c0 = arith.constant 0 : index
    %c0_0 = arith.constant 0 : index
    %c0_1 = arith.constant 0 : index
    %0 = vector.load %arg1[%c0, %c0_0, %c0_1] : memref<8x8x128xf32, #tpu.memory_space<vmem>>, vector<8x8x128xf32>
    %1 = vector.shape_cast %0 : vector<8x8x128xf32> to vector<64x128xf32>
    %c0_2 = arith.constant 0 : index
    %c0_3 = arith.constant 0 : index
    %2 = vector.load %arg3[%c0_2, %c0_3] : memref<64x128xf32, #tpu.memory_space<vmem>>, vector<64x128xf32>
    %cst = arith.constant dense<0.000000e+00> : vector<64x64xf32>
    %3 = tpu.matmul %1, %2, %cst {dimension_numbers = #tpu.dot_dimension_numbers<[1], [1], [0], [0], [0, 0, 1, 0], [], []>} : vector<64x128xf32>, vector<64x128xf32>, vector<64x64xf32> -> vector<64x64xf32>
    %c0_4 = arith.constant 0 : index
    %c0_5 = arith.constant 0 : index
    %4 = vector.load %arg4[%c0_4, %c0_5] : memref<1x64xf32, #tpu.memory_space<vmem>>, vector<1x64xf32>
    %5 = vector.broadcast %4 : vector<1x64xf32> to vector<64x64xf32>
    %6 = arith.addf %3, %5 : vector<64x64xf32>
    %7 = math.tanh %6 : vector<64x64xf32>
    %8 = vector.shape_cast %7 : vector<64x64xf32> to vector<8x8x64xf32>
    %c0_6 = arith.constant 0 : index
    %c0_7 = arith.constant 0 : index
    %9 = vector.load %arg5[%c0_6, %c0_7] : memref<1x64xf32, #tpu.memory_space<vmem>>, vector<1x64xf32>
    %10 = vector.shape_cast %9 : vector<1x64xf32> to vector<1x1x64xf32>
    %11 = vector.broadcast %10 : vector<1x1x64xf32> to vector<8x8x64xf32>
    %12 = arith.mulf %8, %11 : vector<8x8x64xf32>
    %cst_8 = arith.constant dense<0.000000e+00> : vector<8x8xf32>
    %13 = vector.multi_reduction <add>, %12, %cst_8 [2] : vector<8x8x64xf32> to vector<8x8xf32>
    %c0_9 = arith.constant 0 : index
    %c0_10 = arith.constant 0 : index
    %14 = vector.load %arg2[%c0_9, %c0_10] : memref<8x1xi32, #tpu.memory_space<vmem>>, vector<8x1xi32>
    %15 = tpu.iota {dimensions = array<i32: 1>} : vector<8x8xi32>
    %16 = vector.broadcast %14 : vector<8x1xi32> to vector<8x8xi32>
    %17 = arith.cmpi slt, %15, %16 : vector<8x8xi32>
    %cst_11 = arith.constant -1.000000e+30 : f32
    %18 = vector.broadcast %cst_11 : f32 to vector<8x8xf32>
    %19 = arith.select %17, %13, %18 : vector<8x8xi1>, vector<8x8xf32>
    %cst_12 = arith.constant dense<0xFF800000> : vector<8xf32>
    %20 = vector.multi_reduction <maximumf>, %19, %cst_12 [1] : vector<8x8xf32> to vector<8xf32>
    %21 = vector.shape_cast %20 : vector<8xf32> to vector<8x1xf32>
    %22 = vector.broadcast %21 : vector<8x1xf32> to vector<8x8xf32>
    %23 = arith.subf %19, %22 : vector<8x8xf32>
    %24 = math.exp %23 : vector<8x8xf32>
    %cst_13 = arith.constant dense<0.000000e+00> : vector<8xf32>
    %25 = vector.multi_reduction <add>, %24, %cst_13 [1] : vector<8x8xf32> to vector<8xf32>
    %26 = vector.shape_cast %25 : vector<8xf32> to vector<8x1xf32>
    %27 = tpu.reciprocal %26 {approx = true} : vector<8x1xf32> -> vector<8x1xf32>
    %28 = vector.broadcast %27 : vector<8x1xf32> to vector<8x8xf32>
    %29 = arith.mulf %24, %28 : vector<8x8xf32>
    %c0_i32 = arith.constant 0 : i32
    %30 = vector.broadcast %c0_i32 : i32 to vector<8x1xi32>
    %31 = arith.cmpi sgt, %14, %30 : vector<8x1xi32>
    %cst_14 = arith.constant 0.000000e+00 : f32
    %32 = vector.shape_cast %31 : vector<8x1xi1> to vector<8x1xi1>
    %33 = vector.broadcast %32 : vector<8x1xi1> to vector<8x8xi1>
    %34 = vector.broadcast %cst_14 : f32 to vector<8x8xf32>
    %35 = arith.select %33, %29, %34 : vector<8x8xi1>, vector<8x8xf32>
    %c0_15 = arith.constant 0 : index
    %c0_16 = arith.constant 0 : index
    %36 = vector.load %arg7[%c0_15, %c0_16] : memref<8x8xf32, #tpu.memory_space<vmem>>, vector<8x8xf32>
    tpu.vector_store %arg7[%c0_15, %c0_16], %35 {strides = array<i32>} : memref<8x8xf32, #tpu.memory_space<vmem>>, vector<8x8xf32>,
    %37 = vector.shape_cast %35 : vector<8x8xf32> to vector<8x8x1xf32>
    %38 = vector.broadcast %37 : vector<8x8x1xf32> to vector<8x8x128xf32>
    %39 = arith.mulf %38, %0 : vector<8x8x128xf32>
    %cst_17 = arith.constant dense<0.000000e+00> : vector<8x128xf32>
    %40 = vector.multi_reduction <add>, %39, %cst_17 [1] : vector<8x8x128xf32> to vector<8x128xf32>
    %c0_18 = arith.constant 0 : index
    %c0_19 = arith.constant 0 : index
    %41 = vector.load %arg6[%c0_18, %c0_19] : memref<8x128xf32, #tpu.memory_space<vmem>>, vector<8x128xf32>
    tpu.vector_store %arg6[%c0_18, %c0_19], %40 {strides = array<i32>} : memref<8x128xf32, #tpu.memory_space<vmem>>, vector<8x128xf32>,
    return
  }
  func.func @transform_0(%arg0: i32) -> (i32, i32, i32) {
    %c0_i32 = arith.constant 0 : i32
    %c0_i32_0 = arith.constant 0 : i32
    %c0_i32_1 = arith.constant 0 : i32
    return %arg0, %c0_i32, %c0_i32_0 : i32, i32, i32
  }
  func.func @transform_1(%arg0: i32) -> (i32, i32) {
    %c0_i32 = arith.constant 0 : i32
    %c0_i32_0 = arith.constant 0 : i32
    return %arg0, %c0_i32 : i32, i32
  }
  func.func @transform_2(%arg0: i32) -> (i32, i32) {
    %c0_i32 = arith.constant 0 : i32
    %c0_i32_0 = arith.constant 0 : i32
    %c0_i32_1 = arith.constant 0 : i32
    return %c0_i32, %c0_i32_0 : i32, i32
  }
  func.func @transform_3(%arg0: i32) -> (i32, i32) {
    %c0_i32 = arith.constant 0 : i32
    %c0_i32_0 = arith.constant 0 : i32
    %c0_i32_1 = arith.constant 0 : i32
    return %c0_i32, %c0_i32_0 : i32, i32
  }
  func.func @transform_4(%arg0: i32) -> (i32, i32) {
    %c0_i32 = arith.constant 0 : i32
    %c0_i32_0 = arith.constant 0 : i32
    %c0_i32_1 = arith.constant 0 : i32
    return %c0_i32, %c0_i32_0 : i32, i32
  }
  func.func @transform_5(%arg0: i32) -> (i32, i32) {
    %c0_i32 = arith.constant 0 : i32
    %c0_i32_0 = arith.constant 0 : i32
    return %arg0, %c0_i32 : i32, i32
  }
  func.func @transform_6(%arg0: i32) -> (i32, i32) {
    %c0_i32 = arith.constant 0 : i32
    %c0_i32_0 = arith.constant 0 : i32
    return %arg0, %c0_i32 : i32, i32
  }
}

</mosaic_0001>

<bundles_post_ra>
// kernel: tpu_custom_call.1
= control target key start
LH: loop header
LB: loop body
LE: loop exit
PB: predicated region body
PF: predicated region fallthrough
CT: control target
= control target key end

     0   :  { %12 = vsyncpa [#allocation3], 0  ;;  %s1488_s0 = inlined_call_operand.hbm [shape: f32[16,8,128], index: 0, kind: input, shape index: {}]   ;;  %s1489_s1 = inlined_call_operand.vmem [shape: s32[16,1], index: 1, kind: input, shape index: {}]   ;;  %s1490_s2 = inlined_call_operand.hbm [shape: f32[64,128], index: 2, kind: input, shape index: {}]   ;;  %s1491_s3 = inlined_call_operand.vmem [shape: f32[1,64], index: 3, kind: input, shape index: {}]   ;;  %s1492_s4 = inlined_call_operand.vmem [shape: f32[1,64], index: 4, kind: input, shape index: {}]   ;;  %s1493_s5 = inlined_call_operand.hbm [shape: f32[16,128], index: 5, kind: output, shape index: {0}]   ;;  %s1494_s6 = inlined_call_operand.vmem [shape: f32[16,8], index: 6, kind: output, shape index: {1}]  }
   0x1   :  { %14 = vsyncpa [#allocation3 + $0x1], 0 }
   0x2   :  { %15 = vsyncpa [#allocation6], 0 }
   0x3   :  { %16 = vsyncpa [#allocation4], 0 }
   0x4   :  { %18 = vsyncpa [#allocation4 + $0x1], 0  ;;  %s1180_s21 = smov 0   ;;  %s1182_s22 = smov 0  }
   0x5   :  { %s1184_s23 = smov 0   ;;  %s1186_s24 = smov 0  }
   0x6 LB: > { %s1201_s25 = sadd.s32 4294967295, %s1137_s24   ;;  %s839_s26 = sadd.s32 4294967294, %s1137_s24   ;;  %s1137_s24 = sphi %s1186_s24, %s1514_s24   ;;  %s1133_s23 = sphi %s1184_s23, %s1513_s23   ;;  %s1129_s22 = sphi %s1182_s22, %s1512_s22   ;;  %s1125_s21 = sphi %s1180_s21, %s1511_s21  }
   0x7   : > { %p44_p0 = scmp.ne.s32.totalorder %s1129_s22, %s1125_s21  ;;  %p1495_p1 = scmp.eq.s32.totalorder %s1201_s25, 0 }
   0x8   : > { %p163_p3 = scmp.eq.s32.totalorder %s839_s26, 1  ;;  %p840_p5 = scmp.ge.s32.totalorder %s1137_s24, 1 }
   0x9   : > { %p1210_p4 = por %p1495_p1, %p44_p0  ;;  %p196_p7 = scmp.lt.s32.totalorder %s1137_s24, 3 }
   0xa   : > { %p1215_p6 = por %p163_p3, %p44_p0  ;;  %s1139_s30 = smov [#allocation5]  }
   0xb   : > { %s1498_s27 = scalar_select %p1210_p4, 1, 0 }
   0xc   : > { %s1499_s28 = scalar_select %p1215_p6, 1, 0 }
   0xd   : > { %p1220_p8 = pnand %p840_p5, %p196_p7  ;;  %s208_s7 = sshll.u32 %s1139_s30, 4  ;;  %s1224_s7 = int_to_ptr.vmem [resolvable:$true] %s208_s7 }
   0xe   : > { %s1236_s9 = sadd.s32 1, %s1137_s24   ;;  %s31_s10 = sadd.s32 1, %s1133_s23 }
   0xf   : > { %s1500_s29 = scalar_select %p1220_p8, 1, 0 }
  0x10   : > { %p935_p9 = pneg %p1220_p8  ;;  %s28_s11 = ssub.s32 %s1137_s24, %s1236_s9 }
  0x11   : > { %s1009_s14 = scalar_lea.hbm %s1490_s2, 1024 }
  0x12   : > { %p1231_p11 = pnand %p935_p9, %p1495_p1  ;;  %p1010_p12 = scmp.ne.s32.totalorder %s1490_s2, %s1009_s14 }
  0x13   : > { %p1016_p5 = scmp.lt.u32.totalorder %s1009_s14, %s1490_s2 }
  0x14   : > { %p1011_p13 = pneg %p1231_p11 }
  0x16   : > { %p1012_p0 = pnand %p1011_p13, %p1010_p12 }
  0x18   : > { %p1013_p3 = pneg %p1012_p0 }
  0x1a   : > { %p1018_p7 = pnand %p1016_p5, %p1013_p3 }
  0x1c   : > { %1021 = shalt.err (!%p1018_p7)
}
  0x1d   : > { %s1022_s19 = scalar_lea.vmem %s1224_s7, 1024  ;;  %p1030_p2 = scmp.lt.s32.totalorder %s1224_s7, %s1224_s7 }
  0x1e   : > { %p1023_p9 = scmp.ne.s32.totalorder %s1224_s7, %s1022_s19  ;;  %p1031_p6 = scmp.lt.s32.totalorder %s1022_s19, %s1022_s19 }
  0x20   : > { %p1025_p10 = pnand %p1023_p9, %p1011_p13  ;;  %p1032_p4 = por %p1031_p6, %p1030_p2 }
  0x22   : > { %p1026_p1 = pneg %p1025_p10 }
  0x24   : > { %p1033_p8 = pnand %p1032_p4, %p1026_p1 }
  0x26   : > { %1036 = shalt.err (!%p1033_p8)
}
  0x27   : > { %s1140_s20 = smov 128   ;;  %s1141_s26 = smov 8  }
  0x28   : > { %938 = dma.hbm_to_vmem [thread:$0]  (!%p1231_p11), %s1490_s2, 1024, %s1224_s7, [#allocation6], %s1140_s20, %s1140_s20, %s1141_s26  }
  0x29   : > { %p29_p1 = scmp.eq.s32.totalorder %s28_s11, 0  ;;  %p38_p2 = scmp.ne.s32.totalorder %s1133_s23, %s1129_s22 }
  0x2a   : > { %p39_p4 = scmp.eq.s32.totalorder %s1137_s24, 0  ;;  %p948_p6 = scmp.lt.s32.totalorder %s1137_s24, 2 }
  0x2b   : > { %s1270_s13 = scalar_select %p29_p1, %s1133_s23, %s31_s10  }
  0x2c   : > { %p40_p8 = por %p39_p4, %p38_p2  ;;  %p1502_p10 = scmp.eq.s32.totalorder %s1201_s25, 1 }
  0x2d   : > { %s228_s8 = sand.u32 1, %s1133_s23   ;;  %s858_s15 = sshll.u32 %s1137_s24, 10 }
  0x2e   : > { %p1274_p12 = por %p1502_p10, %p38_p2  ;;  %s843_s16 = sshll.u32 %s228_s8, 6 }
  0x2f   : > { %s1283_s19 = scalar_lea.hbm %s1488_s0, %s858_s15  ;;  %s232_s7 = scalar_lea.vmem [#allocation2], %s843_s16 }
  0x30   : > { %s239_s10 = sshll.u32 %s232_s7, 4  ;;  %p1285_p11 = pnand %p948_p6, %p40_p8  ;;  %s1289_s10 = int_to_ptr.vmem [resolvable:$true] %s239_s10 }
  0x31   : > { %s1291_s30 = scalar_lea.sflag [#allocation3], %s228_s8  ;;  %s1037_s12 = scalar_lea.hbm %s1283_s19, 1024 }
  0x32   : > { %p1038_p13 = scmp.ne.s32.totalorder %s1283_s19, %s1037_s12  ;;  %p1039_p0 = pneg %p1285_p11 }
  0x33   : > { %s1042_s17 = scalar_lea.hbm %s1488_s0, 2048  ;;  %p1043_p7 = scmp.lt.u32.totalorder %s1283_s19, %s1488_s0 }
  0x34   : > { %p1040_p3 = pnand %p1039_p0, %p1038_p13  ;;  %p1044_p9 = scmp.lt.u32.totalorder %s1042_s17, %s1037_s12 }
  0x35   : > { %p1046_p2 = scmp.lt.u32.totalorder %s1037_s12, %s1283_s19 }
  0x36   : > { %p1041_p5 = pneg %p1040_p3  ;;  %p1045_p1 = por %p1044_p9, %p1043_p7 }
  0x38   : > { %p1047_p4 = por %p1046_p2, %p1045_p1 }
  0x3a   : > { %p1048_p6 = pnand %p1047_p4, %p1041_p5 }
  0x3c   : > { %1051 = shalt.err (!%p1048_p6)
}
  0x3d   : > { %s1052_s8 = scalar_lea.vmem %s1289_s10, 1024  ;;  %s1142_s15 = smov [#allocation2]  }
  0x3e   : > { %p1053_p8 = scmp.ne.s32.totalorder %s1289_s10, %s1052_s8  ;;  %s1057_s16 = sshll.u32 %s1142_s15, 4  ;;  %s1058_s16 = int_to_ptr.vmem [resolvable:$false] %s1057_s16 }
  0x3f   : > { %s1059_s18 = scalar_lea.vmem %s1058_s16, 2048  ;;  %p1060_p3 = scmp.lt.s32.totalorder %s1289_s10, %s1058_s16 }
  0x40   : > { %p1055_p10 = pnand %p1053_p8, %p1039_p0  ;;  %p1061_p7 = scmp.lt.s32.totalorder %s1059_s18, %s1052_s8 }
  0x42   : > { %p1056_p13 = pneg %p1055_p10  ;;  %p1062_p9 = por %p1061_p7, %p1060_p3 }
  0x44   : > { %p1063_p1 = pnand %p1062_p9, %p1056_p13 }
  0x46   : > { %1066 = shalt.err (!%p1063_p1)
}
  0x47   : > { %942 = dma.hbm_to_vmem [thread:$0]  (!%p1285_p11), %s1283_s19, 1024, %s1289_s10, %s1291_s30, %s1140_s20, %s1140_s20, %s1141_s26  }
  0x48   : > { %p1505_p0 = scmp.ne.s32.totalorder %s1500_s29, 0 }
  0x49   : > { %s1325_s12 = sand.u32 (!%p1505_p0), 1, %s1129_s22   ;;  %p1506_p5 = scmp.ne.s32.totalorder (!%p1505_p0), %s1498_s27, 0 }
  0x4a   : > { %258 = sbr.rel (%p1505_p0) target bundleno = 994 (0x3e2), region = 40  ;;  %s847_s17 = sshll.u32 (!%p1505_p0), %s1325_s12, 6 }
  0x4b   : > { %s261_s7 = scalar_lea.sflag (!%p1505_p0), [#allocation3], %s1325_s12  ;;  %s1329_s8 = scalar_lea.vmem (!%p1505_p0), [#allocation2], %s847_s17 }
  0x51   : > { %1112 = dma.done.wait (%p1506_p5), %s261_s7, 1024  }
  0x52   : > { %1114 = vsyncadd (%p1506_p5), %s261_s7, 4294966272  ;;  %p1507_p11 = scmp.eq.s32.totalorder %s1201_s25, 0 }
  0x54   : > { %1116 = dma.done.wait (%p1507_p11), [#allocation6], 1024   ;;  %p1508_p2 = pmov %p1507_p11 }
  0x55   : > { %v322_v0 = vld [vmem:[#allocation5] sm:$0xff]  ;;  %v323_v1 = vld [vmem:[#allocation5 + $0x8] sm:$0xff]  ;;  %v324_v2 = vld [vmem:[#allocation5 + $0x10] sm:$0xff]  ;;  %v1143_v20 = vmov 0   ;;  %vm465_vm0 = vcmask 523264   ;;  %p306_p4 = scmp.lt.s32.totalorder %s1201_s25, 1 }
  0x56   : > { %1118 = vsyncadd (%p1508_p2), [#allocation6], 4294966272  ;;  %v903_v3 = vpack.c.bf16 %v323_v1, %v322_v0  ;;  %v325_v4 = vld [vmem:[#allocation5 + $0x18] sm:$0xff]  ;;  %v1340_v6 = vld [vmem:[%s1329_s8] sm:$0xff]  ;;  %987 = vset.pattern.permute.xlu0 %v1143_v20  ;;  %988 = vset.pattern.permute.xlu1 %v1143_v20  ;;  %v491_v0 = vlaneseq  ;;  %vm537_vm1 = vcmask 1041409   ;;  %vm539_vm2 = vcmask 1042434  }
  0x57   : > { %v907_v5 = vpack.c.bf16 %v325_v4, %v324_v2  ;;  %v1343_v7 = vld [vmem:[%s1329_s8 + $0x20] sm:$0xff]  ;;  %v327_v9 = vld [vmem:[#allocation5 + $0x28] sm:$0xff]  ;;  %891 = vmatprep.mubr.f32.mxu0 %v1340_v6  ;;  %v328_v11 = vld [vmem:[#allocation5 + $0x30] sm:$0xff]  ;;  %s1389_s19 = scalar_select %p306_p4, %s1201_s25, 1  ;;  %vm541_vm3 = vcmask 1043459   ;;  %vm543_vm4 = vcmask 1044484  }
  0x58   : > { %904 = vmatprep.subr.bf16.mxu0 %v903_v3  ;;  %919 = vmatprep.subr.bf16.mxu1 %v903_v3  ;;  %v326_v8 = vld [vmem:[#allocation5 + $0x20] sm:$0xff]  ;;  %v329_v12 = vld [vmem:[#allocation5 + $0x38] sm:$0xff]  ;;  %v1348_v14 = vld [vmem:[%s1329_s8 + $0x8] sm:$0xff]  ;;  %v492_v1 = vand.u32 127, %v491_v0  ;;  %v1397_v2 = vshrl.u32 %v491_v0, 7  ;;  %vm545_vm5 = vcmask 1045509  }
  0x59   : > { %906 = vmatpush3.bf16.xpose.msra.mxu0 %v903_v3  ;;  %923 = vmatpush3.bf16.xpose.msra.mxu1 %v903_v3  ;;  %v911_v10 = vpack.c.bf16 %v327_v9, %v326_v8  ;;  %v915_v13 = vpack.c.bf16 %v329_v12, %v328_v11  ;;  %v1351_v15 = vld [vmem:[%s1329_s8 + $0x28] sm:$0xff]  ;;  %v1354_v16 = vld [vmem:[%s1329_s8 + $0x10] sm:$0xff]  ;;  %v1363_v18 = vld [vmem:[%s1329_s8 + $0x18] sm:$0xff]  ;;  %s850_s10 = sshll.u32 %s1389_s19, 3  ;;  %vm547_vm6 = vcmask 1046534   ;;  %vm549_vm7 = vcmask 1047559  }
  0x5a   : > { %908 = vmatprep.subr.bf16.mxu0 %v907_v5  ;;  %920 = vmatprep.subr.bf16.mxu1 %v907_v5  ;;  %v1357_v17 = vld [vmem:[%s1329_s8 + $0x30] sm:$0xff]  ;;  %v1367_v19 = vld [vmem:[%s1329_s8 + $0x38] sm:$0xff]  ;;  %v852_v21 = vld [vmem:[%s1491_s3] ss:$0 sm:$0xff]  ;;  %s309_s15 = scalar_lea.vmem %s1489_s1, %s850_s10  ;;  %v507_v4 = vsub.s32 %v492_v1, %v1397_v2  ;;  %vm553_vm8 = vcmask 64512   ;;  %s313_s17 = scalar_lea.vmem %s1494_s6, %s850_s10 }
  0x5b   : > { %897 = vmatprep.mubr.f32.mxu1 %v1343_v7  ;;  %v853_v38 = vld [vmem:[%s1492_s4] ss:$0 sm:$0xff]  ;;  %s849_s7 = sshll.u32 %s1325_s12, 3  ;;  %s855_s8 = sshll.u32 %s1201_s25, 7 }
  0x5c   : > { %v490_v63 = vld [vmem:[%s309_s15] sm:$0xff]  ;;  %s298_s27 = scalar_lea.vmem [#allocation7], %s849_s7  ;;  %s1443_s19 = scalar_lea.hbm %s1493_s5, %s855_s8 }
  0x5d   : > { %vm565_vm10 = vcmp.gt.s32.totalorder %v490_v63, 0  ;;  %s720_s29 = sshll.u32 %s298_s27, 4  ;;  %s703_s25 = scalar_lea.sflag [#allocation4], %s1325_s12  ;;  %s1445_s29 = int_to_ptr.vmem [resolvable:$true] %s720_s29 }
  0x5e   : > { %s1067_s10 = scalar_lea.vmem %s1445_s29, 128  ;;  %s1144_s11 = smov [#allocation7]  }
  0x5f   : > { %p1068_p6 = scmp.ne.s32.totalorder %s1445_s29, %s1067_s10  ;;  %s1071_s30 = sshll.u32 %s1144_s11, 4  ;;  %s1072_s30 = int_to_ptr.vmem [resolvable:$false] %s1071_s30 }
  0x60   : > { %s1073_s15 = scalar_lea.vmem %s1072_s30, 256  ;;  %p1074_p13 = scmp.lt.s32.totalorder %s1445_s29, %s1072_s30 }
  0x61   : > { %910 = vmatpush3.bf16.xpose.msra.mxu0 %v907_v5  ;;  %924 = vmatpush3.bf16.xpose.msra.mxu1 %v907_v5  ;;  %p1069_p8 = pnand %p1068_p6, %p1274_p12  ;;  %p1075_p3 = scmp.lt.s32.totalorder %s1073_s15, %s1067_s10 }
  0x62   : > { %912 = vmatprep.subr.bf16.mxu0 %v911_v10  ;;  %921 = vmatprep.subr.bf16.mxu1 %v911_v10 }
  0x63   : > { %p1070_p10 = pneg %p1069_p8  ;;  %p1076_p7 = por %p1075_p3, %p1074_p13 }
  0x65   : > { %p1077_p9 = pnand %p1076_p7, %p1070_p10 }
  0x69   : > { %914 = vmatpush3.bf16.xpose.msra.mxu0 %v911_v10  ;;  %925 = vmatpush3.bf16.xpose.msra.mxu1 %v911_v10 }
  0x6a   : > { %916 = vmatprep.subr.bf16.mxu0 %v915_v13  ;;  %922 = vmatprep.subr.bf16.mxu1 %v915_v13 }
  0x71   : > { %918 = vmatpush3.bf16.xpose.msra.mxu0 %v915_v13  ;;  %926 = vmatpush3.bf16.xpose.msra.mxu1 %v915_v13 }
  0x78   : > { %892 = vmatmul.mubr.f32.vlgmr.msra.gmra.mrb[0].mxu0 %v1348_v14  ;;  %898 = vmatmul.mubr.f32.vlgmr.msra.gmra.mrb[0].mxu1 %v1351_v15 }
  0x79   : > { %894 = vmatprep.mubr.f32.mxu0 %v1354_v16  ;;  %900 = vmatprep.mubr.f32.mxu1 %v1357_v17 }
  0x7c   : > { %895 = vmatmul.mubr.f32.gmra.mrb[2].mxu0 %v1363_v18  ;;  %901 = vmatmul.mubr.f32.gmra.mrb[2].mxu1 %v1367_v19 }
 0x14b   : > { %v893_v22 = vpop.f32.mrb[0].mxu0  ;;  %v899_v23 = vpop.f32.mrb[0].mxu1 }
 0x14c   : > { %v409_v24 = vadd.f32 %v893_v22, %v852_v21  ;;  %v403_v25 = vpop.f32.mrb[1].mxu0  ;;  %v423_v26 = vpop.f32.mrb[1].mxu1  ;;  %v429_v36 = vadd.f32 %v899_v23, %v852_v21 }
 0x14d   : > { %v404_v27 = vadd.f32 %v852_v21, %v403_v25  ;;  %v424_v28 = vadd.f32 %v852_v21, %v423_v26 }
 0x14e   : > { %989 = vtanh.f32 %v409_v24 }
 0x14f   : > { %991 = vtanh.f32 %v404_v27  ;;  %v896_v29 = vpop.f32.mrb[2].mxu0  ;;  %v902_v30 = vpop.f32.mrb[2].mxu1 }
 0x150   : > { %v419_v31 = vadd.f32 %v896_v29, %v852_v21  ;;  %v413_v32 = vpop.f32.mrb[3].mxu0  ;;  %v433_v33 = vpop.f32.mrb[3].mxu1  ;;  %993 = vtanh.f32 %v424_v28  ;;  %v439_v37 = vadd.f32 %v902_v30, %v852_v21 }
 0x151   : > { %v414_v34 = vadd.f32 %v852_v21, %v413_v32  ;;  %v434_v35 = vadd.f32 %v852_v21, %v433_v33 }
 0x152   : > { %995 = vtanh.f32 %v419_v31 }
 0x153   : > { %997 = vtanh.f32 %v414_v34 }
 0x154   : > { %999 = vtanh.f32 %v434_v35 }
 0x155   : > { %1001 = vtanh.f32 %v429_v36 }
 0x156   : > { %1003 = vtanh.f32 %v439_v37 }
 0x158   : > { %v990_v39 = vpop.eup %989 }
 0x159   : > { %v992_v40 = vpop.eup %991  ;;  %v458_v41 = vmul.f32 %v990_v39, %v853_v38 }
 0x15a   : > { %v994_v42 = vpop.eup %993  ;;  %v457_v44 = vmul.f32 %v992_v40, %v853_v38 }
 0x15b   : > { %v469_v43 = vsel %vm465_vm0, %v458_v41, 0.0  ;;  %v461_v48 = vmul.f32 %v994_v42, %v853_v38 }
 0x15c   : > { %v996_v45 = vpop.eup %995  ;;  %470 = vadd.xlane.f32.xlu0 %v469_v43  ;;  %v466_v51 = vsel %vm465_vm0, %v457_v44, 0.0  ;;  %v566_v44 = vsel %vm565_vm10, 1, %v1143_v20 }
 0x15d   : > { %v998_v46 = vpop.eup %997  ;;  %v460_v47 = vmul.f32 %v996_v45, %v853_v38  ;;  %v478_v54 = vsel %vm465_vm0, %v461_v48, 0.0  ;;  %v610_v48 = vsub.s32 5, %v1397_v2 }
 0x15e   : > { %v1000_v49 = vpop.eup %999  ;;  %v459_v52 = vmul.f32 %v998_v46, %v853_v38 }
 0x15f   : > { %v475_v50 = vsel %vm465_vm0, %v460_v47, 0.0  ;;  %v1002_v53 = vpop.eup %1001  ;;  %v463_v55 = vmul.f32 %v1000_v49, %v853_v38  ;;  %v575_v49 = vsub.s32 0, %v1397_v2 }
 0x160   : > { %476 = vadd.xlane.f32.xlu1 %v475_v50  ;;  %467 = vadd.xlane.f32.xlu0 %v466_v51  ;;  %v472_v56 = vsel %vm465_vm0, %v459_v52, 0.0  ;;  %v462_v57 = vmul.f32 %v1002_v53, %v853_v38  ;;  %v1004_v58 = vpop.eup %1003  ;;  %v624_v53 = vsub.s32 7, %v1397_v2 }
 0x161   : > { %v484_v59 = vsel %vm465_vm0, %v463_v55, 0.0  ;;  %v464_v61 = vmul.f32 %v1004_v58, %v853_v38 }
 0x162   : > { %v481_v60 = vsel %vm465_vm0, %v462_v57, 0.0  ;;  %v589_v57 = vsub.s32 2, %v1397_v2 }
 0x163   : > { %v487_v62 = vsel %vm465_vm0, %v464_v61, 0.0  ;;  %v603_v61 = vsub.s32 4, %v1397_v2 }
 0x164   : > { %473 = vadd.xlane.f32.xlu1 %v472_v56  ;;  %479 = vadd.xlane.f32.xlu0 %v478_v54  ;;  %v582_v54 = vsub.s32 1, %v1397_v2 }
 0x168   : > { %482 = vadd.xlane.f32.xlu1 %v481_v60  ;;  %485 = vadd.xlane.f32.xlu0 %v484_v59  ;;  %v596_v59 = vsub.s32 3, %v1397_v2 }
 0x16c   : > { %488 = vadd.xlane.f32.xlu1 %v487_v62 }
 0x17e   : > { %494 = vperm.xlu0 %987, %v490_v63   ;;  %v617_v63 = vsub.s32 6, %v1397_v2 }
 0x1e9   : > { %v471_v3 = vpop.xlane.xlu0 %470 }
 0x1ea   : > { %v512_v10 = vrot.slane %v471_v3, %v507_v4 }
 0x1ed   : > { %v477_v5 = vpop.xlane.xlu1 %476  ;;  %v468_v8 = vpop.xlane.xlu0 %467 }
 0x1ee   : > { %v508_v9 = vrot.slane %v468_v8, %v507_v4  ;;  %v520_v21 = vrot.slane %v477_v5, %v507_v4 }
 0x1f0   : > { %v538_v22 = vsel %vm537_vm1, %v512_v10, %v508_v9 }
 0x1f1   : > { %v474_v11 = vpop.xlane.xlu1 %473  ;;  %v480_v12 = vpop.xlane.xlu0 %479 }
 0x1f2   : > { %v516_v13 = vrot.slane %v474_v11, %v507_v4  ;;  %v524_v25 = vrot.slane %v480_v12, %v507_v4 }
 0x1f4   : > { %v540_v23 = vsel %vm539_vm2, %v516_v13, %v538_v22 }
 0x1f5   : > { %v542_v24 = vsel %vm541_vm3, %v520_v21, %v540_v23  ;;  %v483_v26 = vpop.xlane.xlu1 %482  ;;  %v486_v28 = vpop.xlane.xlu0 %485 }
 0x1f6   : > { %v528_v27 = vrot.slane %v483_v26, %v507_v4  ;;  %v544_v29 = vsel %vm543_vm4, %v524_v25, %v542_v24  ;;  %v532_v30 = vrot.slane %v486_v28, %v507_v4 }
 0x1f8   : > { %v546_v32 = vsel %vm545_vm5, %v528_v27, %v544_v29 }
 0x1f9   : > { %v489_v31 = vpop.xlane.xlu1 %488  ;;  %v548_v35 = vsel %vm547_vm6, %v532_v30, %v546_v32 }
 0x1fa   : > { %v536_v33 = vrot.slane %v489_v31, %v507_v4 }
 0x1fc   : > { %v550_v36 = vsel %vm549_vm7, %v536_v33, %v548_v35 }
 0x1fd   : > { %v495_v34 = vpop.permute.xlu0 %494 }
 0x1fe   : > { %vm496_vm9 = vcmp.lt.s32.totalorder %v492_v1, %v495_v34 }
 0x1ff   : > { %v552_v37 = vsel %vm496_vm9, %v550_v36, -1e+30 }
 0x200   : > { %v554_v38 = vsel %vm553_vm8, %v552_v37, -inf }
 0x201   : > { %555 = vmax.xlane.f32.xlu1 %v554_v38 }
 0x28e   : > { %v556_v39 = vpop.xlane.xlu1 %555 }
 0x28f   : > { %v557_v40 = vsub.f32 %v552_v37, %v556_v39 }
 0x291   : > { %v558_v41 = vmul.f32 1.442695, %v557_v40 }
 0x293   : > { %1005 = vpow2.f32 %v558_v41 }
 0x29d   : > { %v1006_v42 = vpop.eup %1005 }
 0x29e   : > { %v560_v43 = vsel %vm553_vm8, %v1006_v42, 0.0 }
 0x29f   : > { %561 = vadd.xlane.f32.xlu1 %v560_v43 }
 0x2b0   : > { %568 = vperm.xlu1 %988, %v566_v44  }
 0x32c   : > { %v562_v45 = vpop.xlane.xlu1 %561 }
 0x32d   : > { %1007 = vrcp.f32 %v562_v45 }
 0x330   : > { %v569_v46 = vpop.permute.xlu1 %568 }
 0x331   : > { %vm570_vm11 = vcmp.eq.s32.totalorder %v569_v46, 1 }
 0x337   : > { %v1008_v47 = vpop.eup %1007 }
 0x338   : > { %v564_v50 = vmul.f32 %v1008_v47, %v1006_v42 }
 0x33a   : > { %v571_v51 = vsel %vm570_vm11, %v564_v50, 0.0 }
 0x33b   : > { %572 = vst.msk [vmem:[%s313_s17] sm:$0xff] %vm553_vm8, %v571_v51  ;;  %v611_v20 = vrot.slane %v571_v51, %v610_v48  ;;  %v576_v52 = vrot.slane %v571_v51, %v575_v49  ;;  %v625_v55 = vrot.slane %v571_v51, %v624_v53  ;;  %v583_v56 = vrot.slane %v571_v51, %v582_v54 }
 0x33c   : > { %v590_v58 = vrot.slane %v571_v51, %v589_v57  ;;  %v597_v60 = vrot.slane %v571_v51, %v596_v59  ;;  %v604_v62 = vrot.slane %v571_v51, %v603_v61  ;;  %v618_v0 = vrot.slane %v571_v51, %v617_v63 }
 0x33d   : > { %613 = vbcast.lane.b32.xlu0 %v611_v20, 256  ;;  %578 = vbcast.lane.b32.xlu1 %v576_v52, 256 }
 0x341   : > { %627 = vbcast.lane.b32.xlu0 %v625_v55, 256  ;;  %585 = vbcast.lane.b32.xlu1 %v583_v56, 256 }
 0x345   : > { %592 = vbcast.lane.b32.xlu1 %v590_v58, 256 }
 0x349   : > { %599 = vbcast.lane.b32.xlu1 %v597_v60, 256 }
 0x34d   : > { %606 = vbcast.lane.b32.xlu1 %v604_v62, 256 }
 0x351   : > { %620 = vbcast.lane.b32.xlu1 %v618_v0, 256 }
 0x3af   : > { %v579_v1 = vpop.permute.xlu1 %578  ;;  %v614_v3 = vpop.permute.xlu0 %613 }
 0x3b0   : > { %v629_v4 = vmul.f32 %v579_v1, %v1340_v6  ;;  %v634_v12 = vmul.f32 %v614_v3, %v1351_v15 }
 0x3b2   : > { %v637_v9 = vrot.slane %v629_v4, 4  ;;  %v667_v24 = vrot.slane %v634_v12, 4 }
 0x3b3   : > { %v586_v5 = vpop.permute.xlu1 %585  ;;  %v628_v10 = vpop.permute.xlu0 %627 }
 0x3b4   : > { %v630_v8 = vmul.f32 %v586_v5, %v1348_v14  ;;  %v638_v22 = vadd.f32 %v637_v9, %v629_v4  ;;  %v636_v2 = vmul.f32 %v628_v10, %v1367_v19  ;;  %v668_v30 = vadd.f32 %v667_v24, %v634_v12 }
 0x3b6   : > { %v643_v11 = vrot.slane %v630_v8, 4  ;;  %v639_v6 = vrot.slane %v638_v22, 2  ;;  %v679_v28 = vrot.slane %v636_v2, 4  ;;  %v669_v38 = vrot.slane %v668_v30, 2 }
 0x3b7   : > { %v593_v13 = vpop.permute.xlu1 %592 }
 0x3b8   : > { %v644_v21 = vadd.f32 %v643_v11, %v630_v8  ;;  %v631_v23 = vmul.f32 %v593_v13, %v1354_v16  ;;  %v640_v35 = vadd.f32 %v639_v6, %v638_v22  ;;  %v680_v19 = vadd.f32 %v679_v28, %v636_v2 }
 0x3ba   : > { %v645_v25 = vrot.slane %v644_v21, 2  ;;  %v649_v26 = vrot.slane %v631_v23, 4  ;;  %v641_v44 = vrot.slane %v640_v35, 1  ;;  %v681_v45 = vrot.slane %v680_v19, 2 }
 0x3bb   : > { %v600_v27 = vpop.permute.xlu1 %599 }
 0x3bc   : > { %v650_v29 = vadd.f32 %v649_v26, %v631_v23  ;;  %v632_v14 = vmul.f32 %v600_v27, %v1363_v18  ;;  %v646_v31 = vadd.f32 %v645_v25, %v644_v21  ;;  %v642_v53 = vadd.f32 %v641_v44, %v640_v35 }
 0x3bd   : > { %v682_v54 = vadd.f32 %v681_v45, %v680_v19 }
 0x3be   : > { %v651_v32 = vrot.slane %v650_v29, 2  ;;  %v655_v15 = vrot.slane %v632_v14, 4  ;;  %v647_v39 = vrot.slane %v646_v31, 1 }
 0x3bf   : > { %v607_v33 = vpop.permute.xlu1 %606  ;;  %v683_v62 = vrot.slane %v682_v54, 1 }
 0x3c0   : > { %v633_v34 = vmul.f32 %v607_v33, %v1343_v7  ;;  %v652_v36 = vadd.f32 %v651_v32, %v650_v29  ;;  %v656_v16 = vadd.f32 %v655_v15, %v632_v14  ;;  %v670_v7 = vadd.f32 %v669_v38, %v668_v30 }
 0x3c1   : > { %v648_v49 = vadd.f32 %v647_v39, %v646_v31  ;;  %v684_v5 = vadd.f32 %v683_v62, %v682_v54 }
 0x3c2   : > { %v661_v37 = vrot.slane %v633_v34, 4  ;;  %v657_v40 = vrot.slane %v656_v16, 2  ;;  %v653_v42 = vrot.slane %v652_v36, 1  ;;  %v671_v58 = vrot.slane %v670_v7, 1 }
 0x3c3   : > { %v621_v41 = vpop.permute.xlu1 %620 }
 0x3c4   : > { %v662_v43 = vadd.f32 %v661_v37, %v633_v34  ;;  %v635_v18 = vmul.f32 %v621_v41, %v1357_v17  ;;  %v658_v46 = vadd.f32 %v657_v40, %v656_v16  ;;  %v654_v51 = vadd.f32 %v653_v42, %v652_v36 }
 0x3c5   : > { %v693_v17 = vsel %vm537_vm1, %v648_v49, %v642_v53  ;;  %v672_v3 = vadd.f32 %v671_v58, %v670_v7 }
 0x3c6   : > { %v663_v47 = vrot.slane %v662_v43, 2  ;;  %v673_v48 = vrot.slane %v635_v18, 4  ;;  %v659_v50 = vrot.slane %v658_v46, 1  ;;  %v694_v59 = vsel %vm539_vm2, %v654_v51, %v693_v17 }
 0x3c8   : > { %v664_v20 = vadd.f32 %v663_v47, %v662_v43  ;;  %v674_v52 = vadd.f32 %v673_v48, %v635_v18  ;;  %v660_v55 = vadd.f32 %v659_v50, %v658_v46 }
 0x3ca   : > { %v665_v56 = vrot.slane %v664_v20, 1  ;;  %v675_v57 = vrot.slane %v674_v52, 2  ;;  %v695_v63 = vsel %vm541_vm3, %v660_v55, %v694_v59 }
 0x3cc   : > { %v666_v60 = vadd.f32 %v665_v56, %v664_v20  ;;  %v676_v61 = vadd.f32 %v675_v57, %v674_v52 }
 0x3ce   : > { %v696_v0 = vsel %vm543_vm4, %v666_v60, %v695_v63  ;;  %v677_v1 = vrot.slane %v676_v61, 1 }
 0x3cf   : > { %v697_v8 = vsel %vm545_vm5, %v672_v3, %v696_v0 }
 0x3d0   : > { %v678_v4 = vadd.f32 %v677_v1, %v676_v61 }
 0x3d2   : > { %v698_v9 = vsel %vm547_vm6, %v678_v4, %v697_v8 }
 0x3d3   : > { %v699_v10 = vsel %vm549_vm7, %v684_v5, %v698_v9 }
 0x3d4   : > { %701 = vst [vmem:[%s298_s27] sm:$0xff] %v699_v10 }
 0x3d5   : > { %1080 = shalt.err (!%p1077_p9)
}
 0x3d6   : > { %s1081_s12 = scalar_lea.hbm %s1443_s19, 128  ;;  %s1085_s17 = scalar_lea.hbm %s1493_s5, 256 }
 0x3d7   : > { %p1082_p1 = scmp.ne.s32.totalorder %s1443_s19, %s1081_s12  ;;  %p1086_p11 = scmp.lt.u32.totalorder %s1443_s19, %s1493_s5 }
 0x3d8   : > { %p1087_p2 = scmp.lt.u32.totalorder %s1085_s17, %s1081_s12  ;;  %p1089_p6 = scmp.lt.u32.totalorder %s1081_s12, %s1443_s19 }
 0x3d9   : > { %p1083_p0 = pnand %p1082_p1, %p1274_p12 }
 0x3da   : > { %p1088_p4 = por %p1087_p2, %p1086_p11 }
 0x3db   : > { %p1084_p5 = pneg %p1083_p0 }
 0x3dc   : > { %p1090_p8 = por %p1089_p6, %p1088_p4 }
 0x3de   : > { %p1091_p10 = pnand %p1090_p8, %p1084_p5 }
 0x3e0   : > { %1094 = shalt.err (!%p1091_p10)
}
 0x3e1   : > { %933 = dma.vmem_to_hbm [thread:$0]  (%p1274_p12), %s1445_s29, 128, %s1443_s19, %s703_s25  }
 0x3e2 PF: > { %s735_s27 = sand.u32 1, %s1125_s21   ;;  %p1509_p13 = scmp.ne.s32.totalorder %s1499_s28, 0 }
 0x3e3   : > { %p1510_p3 = scmp.ge.s32.totalorder %s1137_s24, 2  ;;  %s736_s20 = scalar_lea.sflag [#allocation4], %s735_s27 }
 0x3e5   : > { %p944_p7 = pnand %p1510_p3, %p1509_p13 }
 0x3e7   : > { %1120 = dma.done.wait (!%p944_p7), %s736_s20, 128  }
 0x3e8   : > { %1122 = vsyncadd (!%p944_p7), %s736_s20, 4294967168  ;;  %p21_p9 = scmp.ge.s32.totalorder %s1236_s9, 4   ;;  %s1511_s21 = smov %s1129_s22 }
 0x3e9   : > { %s1512_s22 = smov %s1133_s23  ;;  %s1513_s23 = smov %s1270_s13 }
 0x3ea   : > { %s1514_s24 = smov %s1236_s9  ;;  %23 = sbr.rel (!%p21_p9) target bundleno = 6 (0x6), region = 104 }
 0x3f1   :  { %748 = vsyncpa [#allocation3], 1 }
 0x3f2   :  { %750 = vsyncpa [#allocation3 + $0x1], 1 }
 0x3f3   :  { %751 = vsyncpa [#allocation6], 1 }
 0x3f4   :  { %752 = vsyncpa [#allocation4], 1 }
 0x3f5   :  { %754 = vsyncpa [#allocation4 + $0x1], 1 }

</bundles_post_ra>
